<compile_context>
chip_gen: v7x
topology: tpu7x:2x2x1
jax: 0.10.0
libtpu: 0.0.40
codegen_flags: <defaults>
</compile_context>

<pallas_src>
import numpy as np
import jax
import jax.numpy as jnp
from jax.experimental import pallas as pl
from jax.experimental.pallas import tpu as pltpu


def gaussian_kernel_np(kernel_size, sigma):
    kernel = np.fromfunction(
        lambda x, y: 1.0 / (2.0 * np.pi * sigma ** 2)
        * np.exp(-(((x - (kernel_size - 1) / 2) ** 2
                    + (y - (kernel_size - 1) / 2) ** 2) / (2 * sigma ** 2))),
        (kernel_size, kernel_size),
    )
    return kernel / np.sum(kernel)


def gaussian_taps_1d(kernel_size, sigma):
    # outer(taps, taps) == the normalized 2D Gaussian above (exactly, in real arith).
    c = (kernel_size - 1) / 2.0
    g = np.exp(-((np.arange(kernel_size) - c) ** 2) / (2.0 * sigma ** 2))
    return g / g.sum()


def _band_matrix(n, taps, pad):
    """B[i, j] = taps[j - i + pad] for |i - j| <= pad, else 0   (shape (n, n))."""
    B = np.zeros((n, n), dtype=np.float32)
    for i in range(n):
        for j in range(max(0, i - pad), min(n, i + pad + 1)):
            B[i, j] = taps[j - i + pad]
    return B


def _make_blur_kernel(bc):
    def blur_kernel(bh_ref, bw_ref, x_ref, o_ref):
        # bh_ref: (H, H) f32  vertical band matrix   (resident in VMEM, fetched once)
        # bw_ref: (W, W) f32  horizontal band matrix (resident in VMEM, fetched once)
        # x_ref : (bc, H, W)  input block
        # o_ref : (bc, H, W)  output block
        bh = bh_ref[...]
        bw = bw_ref[...]
        for c in range(bc):  # static unroll; bc is kept small by _choose_block_channels
            xc = x_ref[c].astype(jnp.float32)                          # (H, W)
            v = jnp.dot(bh, xc, preferred_element_type=jnp.float32)    # vertical pass
            y = jnp.dot(v, bw, preferred_element_type=jnp.float32)     # horizontal pass
            o_ref[c] = y.astype(o_ref.dtype)
    return blur_kernel


def _tpu_vmem_capacity_bytes():
    try:
        info = pltpu.get_tpu_info()
        cap = getattr(info, "vmem_capacity_bytes", None)
        if cap:
            return int(cap)
    except Exception:
        pass
    return 64 * 1024 * 1024  # conservative default (v7x per-TC VMEM)


def _choose_block_channels(nc, H, W, budget_bytes, min_steps=4, max_bc=16):
    plane = H * W * 4
    band = 2 * (H * H + W * W) * 4  # resident band matrices (double-buffer allocation)

    def step_bytes(bc):
        # 2x double-buffered input + 2x double-buffered output
        # + ~4 live f32 temporaries (cast / intermediate / result) + band matrices.
        return (2 + 2) * bc * plane + 4 * plane + band

    # Keep the grid long enough for pipelining and v7x megacore sharding.
    bc_cap = max(1, nc // min(min_steps, nc))
    bc_cap = min(bc_cap, max_bc)
    best = 1
    for d in range(1, nc + 1):
        if nc % d == 0 and d <= bc_cap and step_bytes(d) <= budget_bytes:
            best = d
    return best


def gaussian_blur(x, channels, kernel_size, sigma):
    """x: (N, C, H, W) float32. Returns blurred (N, C, H, W)."""
    N, C, H, W = x.shape
    assert C == channels
    # F.conv2d with padding=k//2 only preserves H, W for odd kernel sizes.
    assert kernel_size % 2 == 1, "GaussianBlur kernel_size must be odd"
    pad = kernel_size // 2
    NC = N * C

    taps = gaussian_taps_1d(kernel_size, sigma)
    bh = jnp.asarray(_band_matrix(H, taps, pad))       # (H, H): left-multiply (vertical)
    bw = jnp.asarray(_band_matrix(W, taps, pad).T)     # (W, W): right-multiply (horizontal)

    xf = x.reshape(NC, H, W)  # free reshape (merge leading dims, no HBM copy)

    vmem_cap = _tpu_vmem_capacity_bytes()
    vmem_limit = min(int(vmem_cap * 3 // 4), 96 * 1024 * 1024)  # ~96 MiB v5e/v6e, ~48 MiB v7x
    budget = int(vmem_limit * 0.6)

    bc = _choose_block_channels(NC, H, W, budget)
    grid = (NC // bc,)
    # TODO(synk): halo row-tiling for single planes whose working set exceeds the
    #   VMEM budget (very large H, W; most relevant on v7x's 64 MiB per-TC VMEM).
    # TODO(synk): roll-based VPU fallback for very large planes on v5e, where the
    #   banded-matmul FLOP blow-up O(H*W*(H+W)) exceeds the HBM roofline.
    # TODO(synk): lane-dense relayout when W % 128 != 0 (narrow images leave lanes
    #   idle and force masked output stores).

    kernel_fn = _make_blur_kernel(bc)

    out = pl.pallas_call(
        kernel_fn,
        out_shape=jax.ShapeDtypeStruct((NC, H, W), x.dtype),
        grid_spec=pltpu.PrefetchScalarGridSpec(
            num_scalar_prefetch=0,
            grid=grid,
            in_specs=[
                pl.BlockSpec((H, H), lambda i: (0, 0)),        # resident across steps
                pl.BlockSpec((W, W), lambda i: (0, 0)),        # resident across steps
                pl.BlockSpec((bc, H, W), lambda i: (i, 0, 0)),
            ],
            out_specs=pl.BlockSpec((bc, H, W), lambda i: (i, 0, 0)),
        ),
        compiler_params=pltpu.CompilerParams(
            dimension_semantics=("parallel",),
            vmem_limit_bytes=vmem_limit,
        ),
    )(bh, bw, xf)

    return out.reshape(N, C, H, W)


def _reference(x, channels, kernel_size, sigma):
    # Pure-JAX reference: depthwise conv (feature_group_count = channels).
    w = jnp.asarray(gaussian_kernel_np(kernel_size, sigma), dtype=jnp.float32)
    w = jnp.broadcast_to(w[None, None], (channels, 1, kernel_size, kernel_size))
    pad = kernel_size // 2
    return jax.lax.conv_general_dilated(
        x, w, window_strides=(1, 1), padding=[(pad, pad), (pad, pad)],
        dimension_numbers=("NCHW", "OIHW", "NCHW"),
        feature_group_count=channels)


if __name__ == "__main__":
    N, C, H, W = 2, 4, 16, 16
    kernel_size, sigma = 5, 2.0

    key = jax.random.PRNGKey(0)
    x = jax.random.normal(key, (N, C, H, W), dtype=jnp.float32)

    y = jax.block_until_ready(gaussian_blur(x, C, kernel_size, sigma))
    y_ref = jax.block_until_ready(_reference(x, C, kernel_size, sigma))

    assert y.shape == (N, C, H, W)
    assert jnp.allclose(y, y_ref, atol=1e-4, rtol=1e-4), \
        float(jnp.max(jnp.abs(y - y_ref)))

    print("KERNEL_OK")
</pallas_src>

<mosaic_0001>
module attributes {stable_mosaic.version = 11 : i64} {
  func.func @blur_kernel(%arg0: i32, %arg1: memref<16x16xf32, #tpu.memory_space<vmem>>, %arg2: memref<16x16xf32, #tpu.memory_space<vmem>>, %arg3: memref<2x16x16xf32, #tpu.memory_space<vmem>>, %arg4: memref<2x16x16xf32, #tpu.memory_space<vmem>>) attributes {dimension_semantics = [#tpu.dimension_semantics<parallel>], iteration_bounds = array<i64: 4>, scalar_prefetch = 0 : i64, scratch_operands = 0 : i64, tpu.core_type = #tpu.core_type<tc>, window_params = [{pipeline_mode = #tpu.pipeline_mode<synchronous>, transform_indices = @transform_0, window_bounds = array<i64: 16, 16>}, {pipeline_mode = #tpu.pipeline_mode<synchronous>, transform_indices = @transform_1, window_bounds = array<i64: 16, 16>}, {transform_indices = @transform_2, window_bounds = array<i64: 2, 16, 16>}, {transform_indices = @transform_3, window_bounds = array<i64: 2, 16, 16>}]} {
    %c0 = arith.constant 0 : index
    %c0_0 = arith.constant 0 : index
    %0 = vector.load %arg1[%c0, %c0_0] : memref<16x16xf32, #tpu.memory_space<vmem>>, vector<16x16xf32>
    %c0_1 = arith.constant 0 : index
    %c0_2 = arith.constant 0 : index
    %1 = vector.load %arg2[%c0_1, %c0_2] : memref<16x16xf32, #tpu.memory_space<vmem>>, vector<16x16xf32>
    %c0_3 = arith.constant 0 : index
    %c0_4 = arith.constant 0 : index
    %c0_5 = arith.constant 0 : index
    %2 = vector.load %arg3[%c0_3, %c0_4, %c0_5] : memref<2x16x16xf32, #tpu.memory_space<vmem>>, vector<1x16x16xf32>
    %3 = vector.shape_cast %2 : vector<1x16x16xf32> to vector<16x16xf32>
    %cst = arith.constant dense<0.000000e+00> : vector<16x16xf32>
    %4 = tpu.matmul %0, %3, %cst {dimension_numbers = #tpu.dot_dimension_numbers<[1], [0], [0], [1], [0, 0, 1, 1], [], []>} : vector<16x16xf32>, vector<16x16xf32>, vector<16x16xf32> -> vector<16x16xf32>
    %cst_6 = arith.constant dense<0.000000e+00> : vector<16x16xf32>
    %5 = tpu.matmul %4, %1, %cst_6 {dimension_numbers = #tpu.dot_dimension_numbers<[1], [0], [0], [1], [0, 0, 1, 1], [], []>} : vector<16x16xf32>, vector<16x16xf32>, vector<16x16xf32> -> vector<16x16xf32>
    %c0_7 = arith.constant 0 : index
    %c0_8 = arith.constant 0 : index
    %c0_9 = arith.constant 0 : index
    %6 = vector.load %arg4[%c0_7, %c0_8, %c0_9] : memref<2x16x16xf32, #tpu.memory_space<vmem>>, vector<1x16x16xf32>
    %7 = vector.shape_cast %6 : vector<1x16x16xf32> to vector<16x16xf32>
    %8 = vector.shape_cast %5 : vector<16x16xf32> to vector<1x16x16xf32>
    tpu.vector_store %arg4[%c0_7, %c0_8, %c0_9], %8 {strides = array<i32>} : memref<2x16x16xf32, #tpu.memory_space<vmem>>, vector<1x16x16xf32>,
    %c1 = arith.constant 1 : index
    %c0_10 = arith.constant 0 : index
    %c0_11 = arith.constant 0 : index
    %9 = vector.load %arg3[%c1, %c0_10, %c0_11] : memref<2x16x16xf32, #tpu.memory_space<vmem>>, vector<1x16x16xf32>
    %10 = vector.shape_cast %9 : vector<1x16x16xf32> to vector<16x16xf32>
    %cst_12 = arith.constant dense<0.000000e+00> : vector<16x16xf32>
    %11 = tpu.matmul %0, %10, %cst_12 {dimension_numbers = #tpu.dot_dimension_numbers<[1], [0], [0], [1], [0, 0, 1, 1], [], []>} : vector<16x16xf32>, vector<16x16xf32>, vector<16x16xf32> -> vector<16x16xf32>
    %cst_13 = arith.constant dense<0.000000e+00> : vector<16x16xf32>
    %12 = tpu.matmul %11, %1, %cst_13 {dimension_numbers = #tpu.dot_dimension_numbers<[1], [0], [0], [1], [0, 0, 1, 1], [], []>} : vector<16x16xf32>, vector<16x16xf32>, vector<16x16xf32> -> vector<16x16xf32>
    %c1_14 = arith.constant 1 : index
    %c0_15 = arith.constant 0 : index
    %c0_16 = arith.constant 0 : index
    %13 = vector.load %arg4[%c1_14, %c0_15, %c0_16] : memref<2x16x16xf32, #tpu.memory_space<vmem>>, vector<1x16x16xf32>
    %14 = vector.shape_cast %13 : vector<1x16x16xf32> to vector<16x16xf32>
    %15 = vector.shape_cast %12 : vector<16x16xf32> to vector<1x16x16xf32>
    tpu.vector_store %arg4[%c1_14, %c0_15, %c0_16], %15 {strides = array<i32>} : memref<2x16x16xf32, #tpu.memory_space<vmem>>, vector<1x16x16xf32>,
    return
  }
  func.func @transform_0(%arg0: i32) -> (i32, i32) {
    %c0_i32 = arith.constant 0 : i32
    %c0_i32_0 = arith.constant 0 : i32
    %c0_i32_1 = arith.constant 0 : i32
    return %c0_i32, %c0_i32_0 : i32, i32
  }
  func.func @transform_1(%arg0: i32) -> (i32, i32) {
    %c0_i32 = arith.constant 0 : i32
    %c0_i32_0 = arith.constant 0 : i32
    %c0_i32_1 = arith.constant 0 : i32
    return %c0_i32, %c0_i32_0 : i32, i32
  }
  func.func @transform_2(%arg0: i32) -> (i32, i32, i32) {
    %c0_i32 = arith.constant 0 : i32
    %c0_i32_0 = arith.constant 0 : i32
    %c0_i32_1 = arith.constant 0 : i32
    return %arg0, %c0_i32, %c0_i32_0 : i32, i32, i32
  }
  func.func @transform_3(%arg0: i32) -> (i32, i32, i32) {
    %c0_i32 = arith.constant 0 : i32
    %c0_i32_0 = arith.constant 0 : i32
    %c0_i32_1 = arith.constant 0 : i32
    return %arg0, %c0_i32, %c0_i32_0 : i32, i32, i32
  }
}

</mosaic_0001>

<bundles_post_ra>
// kernel: tpu_custom_call.1
= control target key start
LH: loop header
LB: loop body
LE: loop exit
PB: predicated region body
PF: predicated region fallthrough
CT: control target
= control target key end

     0   :  { %8 = vsyncpa [#allocation3], 0  ;;  %s1271_s0 = inlined_call_operand.hbm [shape: f32[16,16], index: 0, kind: input, shape index: {}]   ;;  %s1272_s1 = inlined_call_operand.hbm [shape: f32[16,16], index: 1, kind: input, shape index: {}]   ;;  %s1273_s2 = inlined_call_operand.hbm [shape: f32[8,16,16], index: 2, kind: input, shape index: {}]   ;;  %s1274_s3 = inlined_call_operand.hbm [shape: f32[8,16,16], index: 3, kind: output, shape index: {}]  }
   0x1   :  { %9 = vsyncpa [#allocation6], 0 }
   0x2   :  { %10 = vsyncpa [#allocation4], 0 }
   0x3   :  { %12 = vsyncpa [#allocation4 + $0x1], 0  ;;  %s1016_s12 = smov 0   ;;  %s1018_s13 = smov 0  }
   0x4   :  { %s1020_s14 = smov 0   ;;  %s1022_s15 = smov 0  }
   0x5 LB: > { %s1037_s16 = sadd.s32 4294967295, %s986_s15   ;;  %s659_s17 = sadd.s32 4294967294, %s986_s15   ;;  %s986_s15 = sphi %s1022_s15, %s1301_s15   ;;  %s982_s14 = sphi %s1020_s14, %s1300_s14   ;;  %s978_s13 = sphi %s1018_s13, %s1299_s13   ;;  %s974_s12 = sphi %s1016_s12, %s1298_s12  }
   0x6   : > { %s1041_s18 = sadd.s32 1, %s986_s15   ;;  %s67_s19 = sadd.s32 1, %s982_s14 }
   0x7   : > { %s64_s20 = ssub.s32 %s986_s15, %s1041_s18  ;;  %p74_p0 = scmp.ne.s32.totalorder %s982_s14, %s978_s13 }
   0x8   : > { %p65_p1 = scmp.eq.s32.totalorder %s64_s20, 0  ;;  %p75_p2 = scmp.eq.s32.totalorder %s986_s15, 0 }
   0x9   : > { %p80_p3 = scmp.ne.s32.totalorder %s978_s13, %s974_s12  ;;  %p1275_p4 = scmp.eq.s32.totalorder %s1037_s16, 0 }
   0xa   : > { %s1053_s21 = scalar_select %p65_p1, %s982_s14, %s67_s19  }
   0xb   : > { %p1055_p5 = por %p75_p2, %p74_p0  ;;  %p1061_p6 = por %p1275_p4, %p80_p3 }
   0xc   : > { %p104_p7 = scmp.eq.s32.totalorder %s1037_s16, 3  ;;  %p110_p8 = scmp.eq.s32.totalorder %s659_s17, 3 }
   0xd   : > { %s1280_s22 = scalar_select %p1055_p5, 1, 0 }
   0xe   : > { %s1281_s23 = scalar_select %p1061_p6, 1, 0 }
   0xf   : > { %p660_p9 = scmp.ge.s32.totalorder %s986_s15, 1  ;;  %p117_p10 = scmp.lt.s32.totalorder %s986_s15, 5 }
  0x10   : > { %p1068_p11 = por %p104_p7, %p74_p0  ;;  %p1072_p12 = por %p110_p8, %p80_p3 }
  0x11   : > { %p1076_p13 = pnand %p660_p9, %p117_p10  ;;  %s988_s27 = smov [#allocation2]  }
  0x12   : > { %s1282_s24 = scalar_select %p1068_p11, 1, 0 }
  0x13   : > { %s1283_s25 = scalar_select %p1072_p12, 1, 0 }
  0x14   : > { %s1284_s26 = scalar_select %p1076_p13, 1, 0 }
  0x15   : > { %p767_p1 = pneg %p1076_p13  ;;  %s129_s28 = sshll.u32 %s988_s27, 4  ;;  %s130_s28 = int_to_ptr.vmem [resolvable:$true] %s129_s28 }
  0x16   : > { %s989_s30 = smov [#allocation5]   ;;  %s826_s7 = scalar_lea.hbm %s1271_s0, 256 }
  0x17   : > { %p1084_p2 = pnand %p767_p1, %p1275_p4  ;;  %s142_s4 = sshll.u32 %s989_s30, 4  ;;  %s143_s4 = int_to_ptr.vmem [resolvable:$true] %s142_s4 }
  0x18   : > { %p827_p3 = scmp.ne.s32.totalorder %s1271_s0, %s826_s7  ;;  %p833_p10 = scmp.lt.u32.totalorder %s826_s7, %s1271_s0 }
  0x19   : > { %p828_p7 = pneg %p1084_p2 }
  0x1b   : > { %p829_p8 = pnand %p828_p7, %p827_p3 }
  0x1d   : > { %p830_p9 = pneg %p829_p8 }
  0x1f   : > { %p835_p1 = pnand %p833_p10, %p830_p9 }
  0x21   : > { %838 = shalt.err (!%p835_p1)
}
  0x22   : > { %s839_s17 = scalar_lea.vmem %s130_s28, 256  ;;  %p847_p11 = scmp.lt.s32.totalorder %s130_s28, %s130_s28 }
  0x23   : > { %p840_p4 = scmp.ne.s32.totalorder %s130_s28, %s839_s17  ;;  %p848_p6 = scmp.lt.s32.totalorder %s839_s17, %s839_s17 }
  0x25   : > { %p842_p0 = pnand %p840_p4, %p828_p7  ;;  %p849_p13 = por %p848_p6, %p847_p11 }
  0x27   : > { %p843_p12 = pneg %p842_p0 }
  0x29   : > { %p850_p5 = pnand %p849_p13, %p843_p12 }
  0x2b   : > { %853 = shalt.err (!%p850_p5)
}
  0x2c   : > { %s990_s19 = smov 128   ;;  %s991_s20 = smov 8  }
  0x2d   : > { %770 = dma.hbm_to_vmem [thread:$0]  (!%p1084_p2), %s1271_s0, 256, %s130_s28, [#allocation3], %s990_s19, %s990_s19, %s991_s20  }
  0x2e   : > { %p1286_p4 = scmp.ne.s32.totalorder %s1280_s22, 0  ;;  %p1287_p0 = scmp.lt.s32.totalorder %s986_s15, 4 }
  0x2f   : > { %s854_s8 = scalar_lea.hbm %s1272_s1, 256 }
  0x30   : > { %p1118_p3 = pnand %p1287_p0, %p1286_p4  ;;  %p855_p5 = scmp.ne.s32.totalorder %s1272_s1, %s854_s8 }
  0x31   : > { %p861_p12 = scmp.lt.u32.totalorder %s854_s8, %s1272_s1 }
  0x32   : > { %s1288_s5 = scalar_select %p1118_p3, 1, 0 }
  0x33   : > { %p857_p6 = pnand %p855_p5, %p828_p7 }
  0x35   : > { %p858_p11 = pneg %p857_p6 }
  0x37   : > { %p863_p13 = pnand %p861_p12, %p858_p11 }
  0x39   : > { %866 = shalt.err (!%p863_p13)
}
  0x3a   : > { %s867_s11 = scalar_lea.vmem %s143_s4, 256  ;;  %p875_p1 = scmp.lt.s32.totalorder %s143_s4, %s143_s4 }
  0x3b   : > { %p868_p8 = scmp.ne.s32.totalorder %s143_s4, %s867_s11  ;;  %p876_p4 = scmp.lt.s32.totalorder %s867_s11, %s867_s11 }
  0x3d   : > { %p870_p9 = pnand %p868_p8, %p828_p7  ;;  %p877_p0 = por %p876_p4, %p875_p1 }
  0x3f   : > { %p871_p10 = pneg %p870_p9 }
  0x41   : > { %p878_p3 = pnand %p877_p0, %p871_p10 }
  0x43   : > { %881 = shalt.err (!%p878_p3)
}
  0x44   : > { %773 = dma.hbm_to_vmem [thread:$0]  (!%p1084_p2), %s1272_s1, 256, %s143_s4, [#allocation6], %s990_s19, %s990_s19, %s991_s20  }
  0x45   : > { %s156_s30 = sand.u32 1, %s986_s15   ;;  %s158_s6 = sand.u32 1, %s982_s14  }
  0x46   : > { %s664_s7 = sshll.u32 %s158_s6, 5  ;;  %s692_s8 = sshll.u32 %s986_s15, 9 }
  0x47   : > { %s1151_s29 = scalar_lea.hbm %s1273_s2, %s692_s8  ;;  %s160_s28 = scalar_lea.vmem [#allocation7], %s664_s7 }
  0x48   : > { %s168_s22 = sshll.u32 %s160_s28, 4  ;;  %s1155_s11 = scalar_lea.sflag [#allocation3], %s156_s30  ;;  %s1153_s22 = int_to_ptr.vmem [resolvable:$true] %s168_s22 }
  0x49   : > { %s882_s4 = scalar_lea.hbm %s1151_s29, 512  ;;  %p1289_p7 = scmp.ne.s32.totalorder %s1288_s5, 0 }
  0x4a   : > { %p883_p2 = scmp.ne.s32.totalorder %s1151_s29, %s882_s4  ;;  %s887_s6 = scalar_lea.hbm %s1273_s2, 2048 }
  0x4b   : > { %p884_p3 = pneg %p1289_p7  ;;  %p888_p11 = scmp.lt.u32.totalorder %s1151_s29, %s1273_s2 }
  0x4c   : > { %p889_p12 = scmp.lt.u32.totalorder %s887_s6, %s882_s4  ;;  %p891_p8 = scmp.lt.u32.totalorder %s882_s4, %s1151_s29 }
  0x4d   : > { %p885_p5 = pnand %p884_p3, %p883_p2 }
  0x4e   : > { %p890_p13 = por %p889_p12, %p888_p11 }
  0x4f   : > { %p886_p6 = pneg %p885_p5 }
  0x50   : > { %p892_p9 = por %p891_p8, %p890_p13 }
  0x52   : > { %p893_p10 = pnand %p892_p9, %p886_p6 }
  0x54   : > { %896 = shalt.err (!%p893_p10)
}
  0x55   : > { %s897_s30 = scalar_lea.vmem %s1153_s22, 512  ;;  %s992_s7 = smov [#allocation7]  }
  0x56   : > { %p898_p1 = scmp.ne.s32.totalorder %s1153_s22, %s897_s30  ;;  %s902_s10 = sshll.u32 %s992_s7, 4  ;;  %s903_s10 = int_to_ptr.vmem [resolvable:$false] %s902_s10 }
  0x57   : > { %s904_s28 = scalar_lea.vmem %s903_s10, 1024  ;;  %p905_p2 = scmp.lt.s32.totalorder %s1153_s22, %s903_s10 }
  0x58   : > { %p900_p4 = pnand %p898_p1, %p884_p3  ;;  %p906_p5 = scmp.lt.s32.totalorder %s904_s28, %s897_s30 }
  0x5a   : > { %p901_p0 = pneg %p900_p4  ;;  %p907_p11 = por %p906_p5, %p905_p2 }
  0x5c   : > { %p908_p12 = pnand %p907_p11, %p901_p0 }
  0x5e   : > { %911 = shalt.err (!%p908_p12)
}
  0x5f   : > { %777 = dma.hbm_to_vmem [thread:$0]  (!%p1289_p7), %s1151_s29, 512, %s1153_s22, %s1155_s11, %s990_s19, %s990_s19, %s991_s20  }
  0x60   : > { %p1290_p3 = scmp.ne.s32.totalorder %s1284_s26, 0 }
  0x61   : > { %p1291_p6 = scmp.eq.s32.totalorder (!%p1290_p3), %s1037_s16, 0 }
  0x62   : > { %180 = sbr.rel (%p1290_p3) target bundleno = 567 (0x237), region = 32 }
  0x69   : > { %957 = dma.done.wait (%p1291_p6), [#allocation3], 256   ;;  %p1292_p13 = pmov %p1291_p6 }
  0x6a   : > { %p1293_p8 = pmov %p1291_p6 }
  0x6b   : > { %959 = vsyncadd (%p1292_p13), [#allocation3], 4294967040 }
  0x6c   : > { %961 = dma.done.wait (%p1293_p8), [#allocation6], 256   ;;  %p1294_p9 = pmov %p1291_p6 }
  0x6d   : > { %s190_s19 = sand.u32 1, %s1037_s16   ;;  %s192_s20 = sand.u32 1, %s978_s13  }
  0x6e   : > { %963 = vsyncadd (%p1294_p9), [#allocation6], 4294967040  ;;  %s1200_s26 = sshll.u32 %s192_s20, 5  ;;  %s191_s5 = scalar_lea.sflag [#allocation3], %s190_s19 }
  0x6f   : > { %s194_s29 = scalar_lea.vmem [#allocation7], %s1200_s26  ;;  %p1295_p7 = scmp.ne.s32.totalorder %s1281_s23, 0 }
  0x71   : > { %965 = dma.done.wait (%p1295_p7), %s191_s5, 512  }
  0x72   : > { %967 = vsyncadd (%p1295_p7), %s191_s5, 4294966784  ;;  %vm225_vm0 = vcmask 130048   ;;  %v223_v0 = vld [vmem:[%s194_s29] sm:$0xff]  ;;  %v224_v1 = vld [vmem:[%s194_s29 + $0x8] sm:$0xff]  ;;  %s216_s23 = scalar_lea.vmem [#allocation8], %s1200_s26  ;;  %s694_s11 = sshll.u32 %s1037_s16, 9 }
  0x73   : > { %v219_v2 = vld [vmem:[#allocation2] sm:$0xff]  ;;  %v739_v3 = vpack.c.bf16 %v224_v1, %v223_v0  ;;  %v677_v4 = vld [vmem:[%s194_s29 + $0x10] sm:$0xff]  ;;  %v678_v5 = vld [vmem:[%s194_s29 + $0x18] sm:$0xff]  ;;  %s567_s22 = sshll.u32 %s216_s23, 4  ;;  %s1224_s27 = scalar_lea.hbm %s1274_s3, %s694_s11  ;;  %s1218_s22 = int_to_ptr.vmem [resolvable:$true] %s567_s22 }
  0x74   : > { %715 = vmatprep.mubr.msk.f32.mxu0 %vm225_vm0, %v219_v2  ;;  %v747_v6 = vpack.c.bf16 %v678_v5, %v677_v4  ;;  %v221_v7 = vld [vmem:[#allocation5] sm:$0xff]  ;;  %v222_v8 = vld [vmem:[#allocation5 + $0x8] sm:$0xff]  ;;  %v220_v10 = vld [vmem:[#allocation2 + $0x8] sm:$0xff]  ;;  %s1230_s16 = scalar_lea.sflag [#allocation4], %s192_s20  ;;  %s912_s6 = scalar_lea.vmem %s1218_s22, 512 }
  0x75   : > { %740 = vmatprep.subr.bf16.mxu0 %v739_v3  ;;  %v743_v9 = vpack.c.bf16 %v222_v8, %v221_v7  ;;  %p913_p10 = scmp.ne.s32.totalorder %s1218_s22, %s912_s6  ;;  %p1296_p1 = scmp.ne.s32.totalorder %s1282_s24, 0 }
  0x76   : > { %742 = vmatpush3.bf16.msra.mxu0 %v739_v3  ;;  %s993_s8 = smov [#allocation8]  }
  0x77   : > { %748 = vmatprep.subr.bf16.mxu0 %v747_v6  ;;  %744 = vmatprep.subr.bf16.mxu1 %v743_v9  ;;  %p914_p4 = pnand %p913_p10, %p1296_p1  ;;  %s916_s9 = sshll.u32 %s993_s8, 4  ;;  %s917_s9 = int_to_ptr.vmem [resolvable:$false] %s916_s9 }
  0x78   : > { %746 = vmatpush3.bf16.msra.mxu1 %v743_v9  ;;  %s918_s30 = scalar_lea.vmem %s917_s9, 1024  ;;  %p919_p2 = scmp.lt.s32.totalorder %s1218_s22, %s917_s9 }
  0x79   : > { %716 = vmatmul.mubr.msk.f32.vlgmr.msra.gmra.mrb[0].mxu0 %vm225_vm0, %v220_v10  ;;  %752 = vmatprep.subr.bf16.mxu1 %v743_v9  ;;  %p915_p0 = pneg %p914_p4  ;;  %p920_p5 = scmp.lt.s32.totalorder %s918_s30, %s912_s6 }
  0x7a   : > { %750 = vmatpush3.bf16.msra.mxu0 %v747_v6  ;;  %729 = vmatprep.mubr.msk.f32.mxu0 %vm225_vm0, %v219_v2 }
  0x7b   : > { %p921_p11 = por %p920_p5, %p919_p2 }
  0x7d   : > { %730 = vmatmul.mubr.msk.f32.vlgmr.msra.gmra.mrb[2].mxu0 %vm225_vm0, %v220_v10  ;;  %p922_p12 = pnand %p921_p11, %p915_p0 }
 0x14c   : > { %v717_v11 = vpop.f32.mrb[0].mxu0 }
 0x14d   : > { %v298_v12 = vpop.f32.mrb[1].mxu0 }
 0x14e   : > { %722 = vmatprep.mubr.msk.f32.mxu1 %vm225_vm0, %v298_v12 }
 0x14f   : > { %723 = vmatmul.mubr.msk.f32.vlgmr.msra.gmra.mrb[0].mxu1 %vm225_vm0, %v717_v11 }
 0x150   : > { %v731_v13 = vpop.f32.mrb[2].mxu0  ;;  %754 = vmatpush3.bf16.msra.mxu1 %v743_v9 }
 0x151   : > { %v459_v14 = vpop.f32.mrb[3].mxu0 }
 0x152   : > { %736 = vmatprep.mubr.msk.f32.mxu1 %vm225_vm0, %v459_v14 }
 0x153   : > { %737 = vmatmul.mubr.msk.f32.vlgmr.msra.gmra.mrb[2].mxu1 %vm225_vm0, %v731_v13 }
 0x222   : > { %v724_v15 = vpop.f32.mrb[0].mxu1 }
 0x223   : > { %389 = vst.msk [vmem:[%s216_s23 + $0x8] sm:$0xff] %vm225_vm0, %v724_v15  ;;  %v379_v16 = vpop.f32.mrb[1].mxu1 }
 0x224   : > { %388 = vst.msk [vmem:[%s216_s23] sm:$0xff] %vm225_vm0, %v379_v16 }
 0x226   : > { %v738_v17 = vpop.f32.mrb[2].mxu1 }
 0x227   : > { %684 = vst.msk [vmem:[%s216_s23 + $0x18] sm:$0xff] %vm225_vm0, %v738_v17  ;;  %v540_v18 = vpop.f32.mrb[3].mxu1 }
 0x228   : > { %683 = vst.msk [vmem:[%s216_s23 + $0x10] sm:$0xff] %vm225_vm0, %v540_v18 }
 0x229   : > { %925 = shalt.err (!%p922_p12)
}
 0x22a   : > { %s926_s7 = scalar_lea.hbm %s1224_s27, 512  ;;  %s930_s19 = scalar_lea.hbm %s1274_s3, 2048 }
 0x22b   : > { %p927_p3 = scmp.ne.s32.totalorder %s1224_s27, %s926_s7  ;;  %p931_p8 = scmp.lt.u32.totalorder %s1224_s27, %s1274_s3 }
 0x22c   : > { %p932_p9 = scmp.lt.u32.totalorder %s930_s19, %s926_s7  ;;  %p934_p10 = scmp.lt.u32.totalorder %s926_s7, %s1224_s27 }
 0x22d   : > { %p928_p6 = pnand %p927_p3, %p1296_p1 }
 0x22e   : > { %p933_p7 = por %p932_p9, %p931_p8 }
 0x22f   : > { %p929_p13 = pneg %p928_p6 }
 0x230   : > { %p935_p4 = por %p934_p10, %p933_p7 }
 0x232   : > { %p936_p0 = pnand %p935_p4, %p929_p13 }
 0x234   : > { %939 = shalt.err (!%p936_p0)
}
 0x235   : > { %s994_s5 = smov 128   ;;  %s995_s29 = smov 8  }
 0x236   : > { %765 = dma.vmem_to_hbm [thread:$0]  (%p1296_p1), %s1218_s22, 512, %s1224_s27, %s1230_s16, %s994_s5, %s994_s5, %s995_s29  }
 0x237 PF: > { %p787_p2 = scmp.ge.s32.totalorder %s986_s15, 2  ;;  %s582_s23 = sand.u32 1, %s974_s12  }
 0x238   : > { %p1297_p5 = scmp.ne.s32.totalorder %s1283_s25, 0  ;;  %s583_s11 = scalar_lea.sflag [#allocation4], %s582_s23 }
 0x23a   : > { %p779_p11 = pnand %p787_p2, %p1297_p5 }
 0x23c   : > { %969 = dma.done.wait (!%p779_p11), %s583_s11, 512  }
 0x23d   : > { %971 = vsyncadd (!%p779_p11), %s583_s11, 4294966784  ;;  %p15_p12 = scmp.ge.s32.totalorder %s1041_s18, 6   ;;  %s1298_s12 = smov %s978_s13 }
 0x23e   : > { %s1299_s13 = smov %s982_s14  ;;  %s1300_s14 = smov %s1053_s21 }
 0x23f   : > { %s1301_s15 = smov %s1041_s18  ;;  %17 = sbr.rel (!%p15_p12) target bundleno = 5 (0x5), region = 86 }
 0x246   :  { %588 = vsyncpa [#allocation3], 1 }
 0x247   :  { %590 = vsyncpa [#allocation3 + $0x1], 1 }
 0x248   :  { %591 = vsyncpa [#allocation6], 1 }
 0x249   :  { %592 = vsyncpa [#allocation4], 1 }
 0x24a   :  { %594 = vsyncpa [#allocation4 + $0x1], 1 }

</bundles_post_ra>
